<compile_context>
chip_gen: v5e
topology: v5e:2x2
jax: 0.10.0
libtpu: 0.0.40
codegen_flags: <defaults>
</compile_context>

<pallas_src>
import math

import jax
import jax.numpy as jnp
from jax.experimental import pallas as pl
from jax.experimental.pallas import tpu as pltpu


def _cdiv(a: int, b: int) -> int:
    return -(-a // b)


def _gated_connector_kernel(alpha_ref, x_ref, o_ref):
    # alpha_ref: (1, cw) f32;  x_ref / o_ref: (row_tile, cw) in the input dtype.
    gate = jnp.tanh(alpha_ref[...])                       # tiny tile -> EUP
    prod = gate * x_ref[...].astype(jnp.float32)          # f32 math -> VPU (free, HBM-bound)
    o_ref[...] = prod.astype(o_ref.dtype)                 # single rounding to out dtype


def _lane_dense_factor(rows: int, dim: int) -> int:
    """Smallest k with (dim*k) % 128 == 0 and rows % k == 0; else 1."""
    if dim % 128 == 0:
        return 1
    k = 128 // math.gcd(dim, 128)
    return k if rows % k == 0 else 1


def _tpu_params():
    """(per-core VMEM bytes, TensorCore count) with safe fallbacks."""
    vmem = 64 * 1024 * 1024            # conservative default (v7x per-TC VMEM)
    try:
        vmem = int(pltpu.get_tpu_info().vmem_capacity_bytes)
    except Exception:
        pass
    cores = 1
    try:
        kind = jax.devices()[0].device_kind.lower()
        if "v7" in kind or "7x" in kind:
            cores = 2                  # v7x has 2 TensorCores per chip
    except Exception:
        pass
    return vmem, cores


def gated_connector(inx: jax.Array, alpha: jax.Array) -> jax.Array:
    """out = tanh(alpha) * inx, with alpha broadcast over all leading axes."""
    orig_shape = inx.shape
    dim = orig_shape[-1]
    assert alpha.shape == (dim,), f"alpha must be ({dim},), got {alpha.shape}"
    assert jnp.issubdtype(inx.dtype, jnp.floating), (
        f"gated_connector expects a floating-point input, got {inx.dtype}")

    total = math.prod(orig_shape)
    if total == 0:
        return inx
    rows = total // dim

    # --- lane-dense layout: widen the last axis to a multiple of 128 lanes ---
    k = _lane_dense_factor(rows, dim)
    # TODO(synk): when dim % 128 != 0 and rows % k != 0 the whole tensor falls
    # back to a sub-128 lane width (masked stores); a main/remainder split would
    # keep >99% lane-dense but costs an extra XLA slice copy (full HBM pass).
    w = dim * k
    rows2 = rows // k

    x2d = inx.reshape(rows2, w)                                  # free row-major reshape
    alpha_wide = jnp.tile(alpha.astype(jnp.float32), k).reshape(1, w)

    # --- chip-aware block budgeting ------------------------------------------
    vmem_cap, tc_count = _tpu_params()
    block_budget = vmem_cap // 8       # in + out, double-buffered => ~4x block resident
    vmem_limit = (vmem_cap * 3) // 4   # 96 MiB on v5e/v6e, 48 MiB on v7x
    itemsize = jnp.dtype(inx.dtype).itemsize
    sublane = max(8, 32 // itemsize)   # 8 (f32), 16 (bf16/f16), 32 (fp8)

    # Lane-axis tiling only when even a minimum-height full-width block would
    # exceed the budget (very wide dim / widened w).
    if sublane * w * itemsize > block_budget:
        cw = max(128, (block_budget // (sublane * itemsize)) // 128 * 128)
    else:
        cw = w
    col_blocks = _cdiv(w, cw)

    # Row tile: biggest multiple of the sublane packing within the budget.
    row_tile = max(sublane, (block_budget // (cw * itemsize)) // sublane * sublane)
    if row_tile >= rows2:
        row_tile = rows2               # single full-extent block (always legal)

    # v7x megacore balance: make the grid-step count a multiple of the TC count
    # when the grid is small.  Single-TC chips (v5e/v6e) skip this entirely —
    # splitting there is pure per-step overhead.
    if tc_count > 1 and rows2 > sublane:
        row_blocks = _cdiv(rows2, row_tile)
        if (row_blocks * col_blocks) % tc_count != 0:
            target_rb = row_blocks
            while (target_rb * col_blocks) % tc_count != 0:
                target_rb += 1
            new_row_tile = max(
                sublane, _cdiv(_cdiv(rows2, target_rb), sublane) * sublane)
            if (_cdiv(rows2, new_row_tile) * col_blocks) % tc_count == 0:
                row_tile = new_row_tile

    grid = (_cdiv(rows2, row_tile), col_blocks)    # ragged edges handled by Pallas

    out2d = pl.pallas_call(
        _gated_connector_kernel,
        out_shape=jax.ShapeDtypeStruct((rows2, w), inx.dtype),
        grid_spec=pltpu.PrefetchScalarGridSpec(
            num_scalar_prefetch=0,
            grid=grid,
            in_specs=[
                pl.BlockSpec((1, cw), lambda i, j: (0, j)),          # gate params (tiny)
                pl.BlockSpec((row_tile, cw), lambda i, j: (i, j)),   # x tiles
            ],
            out_specs=pl.BlockSpec((row_tile, cw), lambda i, j: (i, j)),
        ),
        compiler_params=pltpu.CompilerParams(
            dimension_semantics=("parallel", "parallel"),            # shard across TCs (v7x)
            vmem_limit_bytes=vmem_limit,
        ),
    )(alpha_wide, x2d)

    return out2d.reshape(orig_shape)


if __name__ == "__main__":
    key = jax.random.PRNGKey(0)
    k_alpha, k_x = jax.random.split(key)

    # GatedConnector(dim): alpha is a (dim,) parameter (zeros at init; use a
    # deterministic nonzero alpha so the kernel is exercised nontrivially).
    batch, seq, dim = 2, 8, 32
    alpha = 0.1 * jax.random.normal(k_alpha, (dim,), dtype=jnp.float32)
    inx = jax.random.normal(k_x, (batch, seq, dim), dtype=jnp.float32)

    out = jax.block_until_ready(gated_connector(inx, alpha))
    ref = jnp.tanh(alpha) * inx
    assert out.shape == inx.shape and out.dtype == inx.dtype
    assert jnp.allclose(out, ref, atol=1e-5, rtol=1e-5)

    # Fallback path: dim not widenable to a multiple of 128 (masked stores).
    alpha2 = 0.1 * jax.random.normal(k_alpha, (33,), dtype=jnp.float32)
    inx2 = jax.random.normal(k_x, (2, 8, 33), dtype=jnp.float32)
    out2 = jax.block_until_ready(gated_connector(inx2, alpha2))
    assert jnp.allclose(out2, jnp.tanh(alpha2) * inx2, atol=1e-5, rtol=1e-5)

    # bf16 path: f32 multiply in-kernel, single rounding to bf16 at the end.
    alpha3 = 0.1 * jax.random.normal(k_alpha, (256,), dtype=jnp.float32)
    inx3 = jax.random.normal(k_x, (4, 8, 256), dtype=jnp.bfloat16)
    out3 = jax.block_until_ready(gated_connector(inx3, alpha3))
    ref3 = (jnp.tanh(alpha3) * inx3.astype(jnp.float32)).astype(jnp.bfloat16)
    assert out3.dtype == jnp.bfloat16
    assert jnp.allclose(out3.astype(jnp.float32), ref3.astype(jnp.float32),
                        atol=2e-2, rtol=2e-2)

    print("KERNEL_OK")
</pallas_src>

<mosaic_0001>
module attributes {stable_mosaic.version = 11 : i64} {
  func.func @_gated_connector_kernel(%arg0: i32, %arg1: i32, %arg2: memref<1x128xf32, #tpu.memory_space<vmem>>, %arg3: memref<4x128xf32, #tpu.memory_space<vmem>>, %arg4: memref<4x128xf32, #tpu.memory_space<vmem>>) attributes {dimension_semantics = [#tpu.dimension_semantics<parallel>, #tpu.dimension_semantics<parallel>], iteration_bounds = array<i64: 1, 1>, scalar_prefetch = 0 : i64, scratch_operands = 0 : i64, tpu.core_type = #tpu.core_type<tc>, window_params = [{transform_indices = @transform_0, window_bounds = array<i64: 1, 128>}, {transform_indices = @transform_1, window_bounds = array<i64: 4, 128>}, {transform_indices = @transform_2, window_bounds = array<i64: 4, 128>}]} {
    %c0 = arith.constant 0 : index
    %c0_0 = arith.constant 0 : index
    %0 = vector.load %arg2[%c0, %c0_0] : memref<1x128xf32, #tpu.memory_space<vmem>>, vector<1x128xf32>
    %1 = math.tanh %0 : vector<1x128xf32>
    %c0_1 = arith.constant 0 : index
    %c0_2 = arith.constant 0 : index
    %2 = vector.load %arg3[%c0_1, %c0_2] : memref<4x128xf32, #tpu.memory_space<vmem>>, vector<4x128xf32>
    %3 = vector.broadcast %1 : vector<1x128xf32> to vector<4x128xf32>
    %4 = arith.mulf %3, %2 : vector<4x128xf32>
    %c0_3 = arith.constant 0 : index
    %c0_4 = arith.constant 0 : index
    %5 = vector.load %arg4[%c0_3, %c0_4] : memref<4x128xf32, #tpu.memory_space<vmem>>, vector<4x128xf32>
    tpu.vector_store %arg4[%c0_3, %c0_4], %4 {strides = array<i32>} : memref<4x128xf32, #tpu.memory_space<vmem>>, vector<4x128xf32>,
    return
  }
  func.func @transform_0(%arg0: i32, %arg1: i32) -> (i32, i32) {
    %c0_i32 = arith.constant 0 : i32
    %c0_i32_0 = arith.constant 0 : i32
    return %c0_i32, %arg1 : i32, i32
  }
  func.func @transform_1(%arg0: i32, %arg1: i32) -> (i32, i32) {
    %c0_i32 = arith.constant 0 : i32
    return %arg0, %arg1 : i32, i32
  }
  func.func @transform_2(%arg0: i32, %arg1: i32) -> (i32, i32) {
    %c0_i32 = arith.constant 0 : i32
    return %arg0, %arg1 : i32, i32
  }
}

</mosaic_0001>

<bundles_post_ra>
// kernel: tpu_custom_call.1
= control target key start
LH: loop header
LB: loop body
LE: loop exit
PB: predicated region body
PF: predicated region fallthrough
CT: control target
= control target key end

     0   :  { %7 = vsyncpa [#allocation3], 0  ;;  %s176_s0 = inlined_call_operand.hbm [shape: f32[1,128], index: 0, kind: input, shape index: {}]   ;;  %s177_s1 = inlined_call_operand.hbm [shape: f32[4,128], index: 1, kind: input, shape index: {}]   ;;  %s178_s2 = inlined_call_operand.hbm [shape: f32[4,128], index: 2, kind: output, shape index: {}]  }
   0x1   :  { %8 = vsyncpa [#allocation6], 0 }
   0x2   :  { %9 = vsyncpa [#allocation4], 0  ;;  %s15_s11 = sshll.u32 %s176_s0, 4  ;;  %s149_s12 = smov [#allocation2]   ;;  %s16_s11 = int_to_ptr.hbm [resolvable:$true] %s15_s11 }
   0x3   :  { %s17_s13 = sshll.u32 %s149_s12, 4  ;;  %s26_s16 = sshll.u32 %s177_s1, 4  ;;  %s18_s13 = int_to_ptr.vmem [resolvable:$true] %s17_s13  ;;  %s27_s16 = int_to_ptr.hbm [resolvable:$true] %s26_s16 }
   0x4   :  { %20 = dma.hbm_to_vmem [thread:$0]  %s16_s11, 16, %s18_s13, [#allocation3]  }
   0x5   :  { %s150_s17 = smov [#allocation5]  }
   0x6   :  { %s28_s18 = sshll.u32 %s150_s17, 4  ;;  %s29_s18 = int_to_ptr.vmem [resolvable:$true] %s28_s18 }
   0x7   :  { %31 = dma.hbm_to_vmem [thread:$0]  %s27_s16, 64, %s29_s18, [#allocation6]  }
   0x8   :  { %143 = dma.done.wait [#allocation3], 16  }
   0x9   :  { %144 = vsyncadd [#allocation3], 4294967280 }
   0xa   :  { %145 = dma.done.wait [#allocation6], 64  }
   0xb   :  { %146 = vsyncadd [#allocation6], 4294967232  ;;  %v40_v0 = vld [vmem:[#allocation2] sm:$0x1]  ;;  %v42_v2 = vld [vmem:[#allocation5] sm:$0xf] }
   0xc   :  { %69 = vtanh.f32 %v40_v0  ;;  %s151_s0 = smov [#allocation7]   ;;  %s55_s1 = sshll.u32 %s178_s2, 4  ;;  %s56_s1 = int_to_ptr.hbm [resolvable:$true] %s55_s1 }
   0xd   :  { %s53_s19 = sshll.u32 %s151_s0, 4  ;;  %s54_s19 = int_to_ptr.vmem [resolvable:$true] %s53_s19 }
  0x12   :  { %v70_v1 = vpop.eup %69 }
  0x13   :  { %v44_v3 = vperm.slane %v70_v1, 0 }
  0x15   :  { %v46_v4 = vmul.f32 %v44_v3, %v42_v2 }
  0x17   :  { %47 = vst [vmem:[#allocation7] sm:$0xf] %v46_v4 }
  0x18   :  { %58 = dma.vmem_to_hbm [thread:$0]  %s54_s19, 64, %s56_s1, [#allocation4]  }
  0x19   :  { %147 = dma.done.wait [#allocation4], 64  }
  0x1a   :  { %148 = vsyncadd [#allocation4], 4294967232 }
  0x1b   :  { %63 = vsyncpa [#allocation3], 1 }
  0x1c   :  { %64 = vsyncpa [#allocation6], 1 }
  0x1d   :  { %65 = vsyncpa [#allocation4], 1 }

</bundles_post_ra>
